<compile_context>
chip_gen: v7x
topology: tpu7x:2x2x1
jax: 0.10.0
libtpu: 0.0.40
codegen_flags: <defaults>
</compile_context>

<pallas_src>
import jax
import jax.numpy as jnp
from jax.experimental import pallas as pl
from jax.experimental.pallas import tpu as pltpu

LANE = 128
SUBLANE = 8
# Large-negative bias masking the padded logit columns.  NOTE: this assumes
# the logits / elementwise path stays f32; if the accumulate dtype is ever
# changed to bf16 this must become a bf16-representable large negative (or
# -inf), otherwise the padded-column masking silently breaks.
NEG_INF = -1e30


def _round_up(x, m):
    return ((x + m - 1) // m) * m


def policy_net_kernel(x_ref, w1_ref, w2_ref, w3_ref, b_ref, out_ref):
    # x_ref: (TM, K) f32   w*: bf16, lane-padded   b_ref: (8, W) f32 fused biases
    HP = w2_ref.shape[0]          # padded hidden width (multiple of 128)
    OP = w3_ref.shape[1]          # padded output width (multiple of 128)

    x = x_ref[...]                # f32 activations
    b1 = b_ref[0:1, :HP]
    b2 = b_ref[1:2, :HP]
    b3 = b_ref[2:3, :OP]          # padded columns hold NEG_INF

    # fc1 + ReLU  (bf16 operands into the MXU, f32 accumulate / elementwise)
    h1 = jnp.dot(x.astype(jnp.bfloat16), w1_ref[...],
                 preferred_element_type=jnp.float32)
    h1 = jnp.maximum(h1 + b1, 0.0)

    # fc2 + ReLU
    h2 = jnp.dot(h1.astype(jnp.bfloat16), w2_ref[...],
                 preferred_element_type=jnp.float32)
    h2 = jnp.maximum(h2 + b2, 0.0)

    # fc3
    logits = jnp.dot(h2.astype(jnp.bfloat16), w3_ref[...],
                     preferred_element_type=jnp.float32) + b3

    # Numerically stable softmax over the (padded) last axis; padded columns
    # carry logit ~ -1e30, so exp() -> 0 and they never touch the denominator.
    # approx reciprocal error (~1e-3 relative) is below the bf16 output
    # quantization, so it costs nothing in achievable accuracy.
    m = jnp.max(logits, axis=-1, keepdims=True)
    e = jnp.exp(logits - m)
    denom = jnp.sum(e, axis=-1, keepdims=True)
    probs = e * pl.reciprocal(denom, approx=True)
    out_ref[...] = probs.astype(out_ref.dtype)     # bf16 store (lane-dense)


def init_policy_net_params(key, input_dim, hidden_dim, output_dim):
    """Matches PolicyNet._init_weights (weights stored as (in, out) for x @ W).

    fc1/fc2: Kaiming normal (fan_in, relu) -> std = sqrt(2/fan_in), bias = 0.1
    fc3:     normal(0, 0.01), bias = 0
    """
    k1, k2, k3 = jax.random.split(key, 3)
    w1 = jax.random.normal(k1, (input_dim, hidden_dim), jnp.float32) * jnp.sqrt(2.0 / input_dim)
    b1 = jnp.full((1, hidden_dim), 0.1, jnp.float32)
    w2 = jax.random.normal(k2, (hidden_dim, hidden_dim), jnp.float32) * jnp.sqrt(2.0 / hidden_dim)
    b2 = jnp.full((1, hidden_dim), 0.1, jnp.float32)
    w3 = jax.random.normal(k3, (hidden_dim, output_dim), jnp.float32) * 0.01
    b3 = jnp.zeros((1, output_dim), jnp.float32)
    return (w1, b1, w2, b2, w3, b3)


def pack_params(params):
    """Real-shape f32 params -> lane-padded bf16 weights + fused f32 bias tile."""
    w1, b1, w2, b2, w3, b3 = params
    input_dim, hidden_dim = w1.shape
    output_dim = w3.shape[1]
    HP = _round_up(hidden_dim, LANE)
    OP = _round_up(output_dim, LANE)
    W = max(HP, OP)

    w1p = jnp.zeros((input_dim, HP), jnp.float32).at[:, :hidden_dim].set(w1).astype(jnp.bfloat16)
    w2p = jnp.zeros((HP, HP), jnp.float32).at[:hidden_dim, :hidden_dim].set(w2).astype(jnp.bfloat16)
    w3p = jnp.zeros((HP, OP), jnp.float32).at[:hidden_dim, :output_dim].set(w3).astype(jnp.bfloat16)

    bias = jnp.zeros((8, W), jnp.float32)                  # single (8,128)-aligned tile
    bias = bias.at[0, :hidden_dim].set(b1.reshape(-1))
    bias = bias.at[1, :hidden_dim].set(b2.reshape(-1))
    bias = bias.at[2, :].set(NEG_INF)                      # mask padded logit cols
    bias = bias.at[2, :output_dim].set(b3.reshape(-1))

    return (w1p, w2p, w3p, bias), (hidden_dim, output_dim)


def policy_net_forward(x, packed, dims, *, tm=1024, return_padded=False):
    """x: (B, input_dim) f32 -> (B, output_dim) bf16 action probabilities.

    With return_padded=True the raw (Bp, OP) bf16 block is returned (no
    post-kernel slice / HBM round-trip); padded rows/columns are garbage/zero
    respectively and real data lives in [:B, :output_dim].
    """
    w1p, w2p, w3p, bias = packed
    _, output_dim = dims
    B, K = x.shape
    HP = w2p.shape[0]
    OP = w3p.shape[1]

    # Batch tile: biggest tile up to `tm` (VMEM is a non-issue at these
    # widths), but capped at ceil(Bp/2) so there are >=2 grid steps whenever
    # the batch allows -> both v7x TensorCores get work via "parallel".
    Bp8 = _round_up(max(B, SUBLANE), SUBLANE)
    half = _round_up(pl.cdiv(Bp8, 2), SUBLANE)
    TM = max(SUBLANE, min(tm, half))
    Bp = _round_up(B, TM)
    if Bp != B:
        x = jnp.pad(x, ((0, Bp - B), (0, 0)))
    grid = (Bp // TM,)

    flops = 2 * Bp * (K * HP + HP * HP + HP * OP)
    bytes_accessed = (Bp * K * 4
                      + (w1p.size + w2p.size + w3p.size) * 2   # bf16 weights
                      + bias.size * 4
                      + Bp * OP * 2)                            # bf16 output
    cost = pl.CostEstimate(flops=flops,
                           transcendentals=Bp * (OP + 1),
                           bytes_accessed=bytes_accessed)

    def run(single_buffer_weights):
        # Constant index_map blocks never re-fetch; requesting a single buffer
        # drops the useless second copy + rotation bookkeeping.
        resident = (dict(pipeline_mode=pl.Buffered(1))
                    if single_buffer_weights else {})
        return pl.pallas_call(
            policy_net_kernel,
            out_shape=jax.ShapeDtypeStruct((Bp, OP), jnp.bfloat16),
            grid=grid,
            in_specs=[
                pl.BlockSpec((TM, K), lambda i: (i, 0)),        # x: tiled on batch
                pl.BlockSpec((K, HP), lambda i: (0, 0), **resident),
                pl.BlockSpec((HP, HP), lambda i: (0, 0), **resident),
                pl.BlockSpec((HP, OP), lambda i: (0, 0), **resident),
                pl.BlockSpec(bias.shape, lambda i: (0, 0), **resident),
            ],
            out_specs=pl.BlockSpec((TM, OP), lambda i: (i, 0)),  # lane-dense vst
            compiler_params=pltpu.CompilerParams(
                dimension_semantics=("parallel",)),              # megacore on v7x
            cost_estimate=cost,
        )(x, w1p, w2p, w3p, bias)

    try:
        out = run(True)
    except Exception:
        # Fallback for JAX builds that reject pipeline_mode / Buffered(1).
        out = run(False)

    if return_padded:
        return out
    # NOTE: this slice is a separate XLA op re-reading the padded output from
    # HBM; at scale prefer return_padded=True or fuse argmax/sampling here.
    return out[:B, :output_dim]


def policy_net_reference(x, params):
    w1, b1, w2, b2, w3, b3 = params
    h1 = jnp.maximum(x @ w1 + b1, 0.0)
    h2 = jnp.maximum(h1 @ w2 + b2, 0.0)
    return jax.nn.softmax(h2 @ w3 + b3, axis=-1)


if __name__ == "__main__":
    key = jax.random.PRNGKey(0)
    k_params, k_x = jax.random.split(key)

    batch, input_dim, hidden_dim, output_dim = 8, 16, 32, 4

    params = init_policy_net_params(k_params, input_dim, hidden_dim, output_dim)
    packed, dims = pack_params(params)
    x = jax.random.normal(k_x, (batch, input_dim), jnp.float32)

    probs = jax.block_until_ready(policy_net_forward(x, packed, dims))
    probs_f32 = probs.astype(jnp.float32)

    # sanity: shape/dtype, rows of a softmax sum to ~1 (bf16 + approx recip)
    assert probs.shape == (batch, output_dim)
    assert probs.dtype == jnp.bfloat16
    assert jnp.allclose(jnp.sum(probs_f32, axis=1), 1.0, atol=2e-2)

    # sanity vs pure-JAX f32 reference (bf16 matmul inputs + bf16 output)
    ref = policy_net_reference(x, params)
    assert jnp.allclose(probs_f32, ref, atol=3e-2), float(jnp.max(jnp.abs(probs_f32 - ref)))

    print("KERNEL_OK")
</pallas_src>

<mosaic_0001>
module attributes {stable_mosaic.version = 11 : i64} {
  func.func @policy_net_kernel(%arg0: i32, %arg1: memref<8x16xf32, #tpu.memory_space<vmem>>, %arg2: memref<16x128xbf16, #tpu.memory_space<vmem>>, %arg3: memref<128x128xbf16, #tpu.memory_space<vmem>>, %arg4: memref<128x128xbf16, #tpu.memory_space<vmem>>, %arg5: memref<8x128xf32, #tpu.memory_space<vmem>>, %arg6: memref<8x128xbf16, #tpu.memory_space<vmem>>) attributes {dimension_semantics = [#tpu.dimension_semantics<parallel>], iteration_bounds = array<i64: 1>, scalar_prefetch = 0 : i64, scratch_operands = 0 : i64, tpu.core_type = #tpu.core_type<tc>, window_params = [{transform_indices = @transform_0, window_bounds = array<i64: 8, 16>}, {pipeline_mode = #tpu.pipeline_mode<synchronous>, transform_indices = @transform_1, window_bounds = array<i64: 16, 128>}, {pipeline_mode = #tpu.pipeline_mode<synchronous>, transform_indices = @transform_2, window_bounds = array<i64: 128, 128>}, {pipeline_mode = #tpu.pipeline_mode<synchronous>, transform_indices = @transform_3, window_bounds = array<i64: 128, 128>}, {pipeline_mode = #tpu.pipeline_mode<synchronous>, transform_indices = @transform_4, window_bounds = array<i64: 8, 128>}, {transform_indices = @transform_5, window_bounds = array<i64: 8, 128>}]} {
    %c0 = arith.constant 0 : index
    %c0_0 = arith.constant 0 : index
    %0 = vector.load %arg1[%c0, %c0_0] : memref<8x16xf32, #tpu.memory_space<vmem>>, vector<8x16xf32>
    %c0_1 = arith.constant 0 : index
    %c0_2 = arith.constant 0 : index
    %1 = vector.load %arg5[%c0_1, %c0_2] : memref<8x128xf32, #tpu.memory_space<vmem>>, vector<1x128xf32>
    %c1 = arith.constant 1 : index
    %c0_3 = arith.constant 0 : index
    %2 = vector.load %arg5[%c1, %c0_3] : memref<8x128xf32, #tpu.memory_space<vmem>>, vector<1x128xf32>
    %c2 = arith.constant 2 : index
    %c0_4 = arith.constant 0 : index
    %3 = vector.load %arg5[%c2, %c0_4] : memref<8x128xf32, #tpu.memory_space<vmem>>, vector<1x128xf32>
    %4 = arith.truncf %0 : vector<8x16xf32> to vector<8x16xbf16>
    %c0_5 = arith.constant 0 : index
    %c0_6 = arith.constant 0 : index
    %5 = vector.load %arg2[%c0_5, %c0_6] : memref<16x128xbf16, #tpu.memory_space<vmem>>, vector<16x128xbf16>
    %cst = arith.constant dense<0.000000e+00> : vector<8x128xf32>
    %6 = tpu.matmul %4, %5, %cst {dimension_numbers = #tpu.dot_dimension_numbers<[1], [0], [0], [1], [0, 0, 1, 1], [], []>} : vector<8x16xbf16>, vector<16x128xbf16>, vector<8x128xf32> -> vector<8x128xf32>
    %7 = vector.broadcast %1 : vector<1x128xf32> to vector<8x128xf32>
    %8 = arith.addf %6, %7 : vector<8x128xf32>
    %cst_7 = arith.constant 0.000000e+00 : f32
    %9 = vector.broadcast %cst_7 : f32 to vector<8x128xf32>
    %10 = arith.maximumf %8, %9 : vector<8x128xf32>
    %11 = arith.truncf %10 : vector<8x128xf32> to vector<8x128xbf16>
    %c0_8 = arith.constant 0 : index
    %c0_9 = arith.constant 0 : index
    %12 = vector.load %arg3[%c0_8, %c0_9] : memref<128x128xbf16, #tpu.memory_space<vmem>>, vector<128x128xbf16>
    %cst_10 = arith.constant dense<0.000000e+00> : vector<8x128xf32>
    %13 = tpu.matmul %11, %12, %cst_10 {dimension_numbers = #tpu.dot_dimension_numbers<[1], [0], [0], [1], [0, 0, 1, 1], [], []>} : vector<8x128xbf16>, vector<128x128xbf16>, vector<8x128xf32> -> vector<8x128xf32>
    %14 = vector.broadcast %2 : vector<1x128xf32> to vector<8x128xf32>
    %15 = arith.addf %13, %14 : vector<8x128xf32>
    %cst_11 = arith.constant 0.000000e+00 : f32
    %16 = vector.broadcast %cst_11 : f32 to vector<8x128xf32>
    %17 = arith.maximumf %15, %16 : vector<8x128xf32>
    %18 = arith.truncf %17 : vector<8x128xf32> to vector<8x128xbf16>
    %c0_12 = arith.constant 0 : index
    %c0_13 = arith.constant 0 : index
    %19 = vector.load %arg4[%c0_12, %c0_13] : memref<128x128xbf16, #tpu.memory_space<vmem>>, vector<128x128xbf16>
    %cst_14 = arith.constant dense<0.000000e+00> : vector<8x128xf32>
    %20 = tpu.matmul %18, %19, %cst_14 {dimension_numbers = #tpu.dot_dimension_numbers<[1], [0], [0], [1], [0, 0, 1, 1], [], []>} : vector<8x128xbf16>, vector<128x128xbf16>, vector<8x128xf32> -> vector<8x128xf32>
    %21 = vector.broadcast %3 : vector<1x128xf32> to vector<8x128xf32>
    %22 = arith.addf %20, %21 : vector<8x128xf32>
    %cst_15 = arith.constant dense<0xFF800000> : vector<8xf32>
    %23 = vector.multi_reduction <maximumf>, %22, %cst_15 [1] : vector<8x128xf32> to vector<8xf32>
    %24 = vector.shape_cast %23 : vector<8xf32> to vector<8x1xf32>
    %25 = vector.broadcast %24 : vector<8x1xf32> to vector<8x128xf32>
    %26 = arith.subf %22, %25 : vector<8x128xf32>
    %27 = math.exp %26 : vector<8x128xf32>
    %cst_16 = arith.constant dense<0.000000e+00> : vector<8xf32>
    %28 = vector.multi_reduction <add>, %27, %cst_16 [1] : vector<8x128xf32> to vector<8xf32>
    %29 = vector.shape_cast %28 : vector<8xf32> to vector<8x1xf32>
    %30 = tpu.reciprocal %29 {approx = true} : vector<8x1xf32> -> vector<8x1xf32>
    %31 = vector.broadcast %30 : vector<8x1xf32> to vector<8x128xf32>
    %32 = arith.mulf %27, %31 : vector<8x128xf32>
    %33 = arith.truncf %32 : vector<8x128xf32> to vector<8x128xbf16>
    %c0_17 = arith.constant 0 : index
    %c0_18 = arith.constant 0 : index
    %34 = vector.load %arg6[%c0_17, %c0_18] : memref<8x128xbf16, #tpu.memory_space<vmem>>, vector<8x128xbf16>
    tpu.vector_store %arg6[%c0_17, %c0_18], %33 {strides = array<i32>} : memref<8x128xbf16, #tpu.memory_space<vmem>>, vector<8x128xbf16>,
    return
  }
  func.func @transform_0(%arg0: i32) -> (i32, i32) {
    %c0_i32 = arith.constant 0 : i32
    %c0_i32_0 = arith.constant 0 : i32
    return %arg0, %c0_i32 : i32, i32
  }
  func.func @transform_1(%arg0: i32) -> (i32, i32) {
    %c0_i32 = arith.constant 0 : i32
    %c0_i32_0 = arith.constant 0 : i32
    %c0_i32_1 = arith.constant 0 : i32
    return %c0_i32, %c0_i32_0 : i32, i32
  }
  func.func @transform_2(%arg0: i32) -> (i32, i32) {
    %c0_i32 = arith.constant 0 : i32
    %c0_i32_0 = arith.constant 0 : i32
    %c0_i32_1 = arith.constant 0 : i32
    return %c0_i32, %c0_i32_0 : i32, i32
  }
  func.func @transform_3(%arg0: i32) -> (i32, i32) {
    %c0_i32 = arith.constant 0 : i32
    %c0_i32_0 = arith.constant 0 : i32
    %c0_i32_1 = arith.constant 0 : i32
    return %c0_i32, %c0_i32_0 : i32, i32
  }
  func.func @transform_4(%arg0: i32) -> (i32, i32) {
    %c0_i32 = arith.constant 0 : i32
    %c0_i32_0 = arith.constant 0 : i32
    %c0_i32_1 = arith.constant 0 : i32
    return %c0_i32, %c0_i32_0 : i32, i32
  }
  func.func @transform_5(%arg0: i32) -> (i32, i32) {
    %c0_i32 = arith.constant 0 : i32
    %c0_i32_0 = arith.constant 0 : i32
    return %arg0, %c0_i32 : i32, i32
  }
}

module attributes {stable_mosaic.version = 11 : i64} {
  func.func @policy_net_kernel(%arg0: i32, %arg1: memref<8x16xf32, #tpu.memory_space<vmem>>, %arg2: memref<16x128xbf16, #tpu.memory_space<vmem>>, %arg3: memref<128x128xbf16, #tpu.memory_space<vmem>>, %arg4: memref<128x128xbf16, #tpu.memory_space<vmem>>, %arg5: memref<8x128xf32, #tpu.memory_space<vmem>>, %arg6: memref<8x128xbf16, #tpu.memory_space<vmem>>) attributes {dimension_semantics = [#tpu.dimension_semantics<parallel>], iteration_bounds = array<i64: 1>, scalar_prefetch = 0 : i64, scratch_operands = 0 : i64, tpu.core_type = #tpu.core_type<tc>, window_params = [{transform_indices = @transform_0, window_bounds = array<i64: 8, 16>}, {pipeline_mode = #tpu.pipeline_mode<synchronous>, transform_indices = @transform_1, window_bounds = array<i64: 16, 128>}, {pipeline_mode = #tpu.pipeline_mode<synchronous>, transform_indices = @transform_2, window_bounds = array<i64: 128, 128>}, {pipeline_mode = #tpu.pipeline_mode<synchronous>, transform_indices = @transform_3, window_bounds = array<i64: 128, 128>}, {pipeline_mode = #tpu.pipeline_mode<synchronous>, transform_indices = @transform_4, window_bounds = array<i64: 8, 128>}, {transform_indices = @transform_5, window_bounds = array<i64: 8, 128>}]} {
    %c0 = arith.constant 0 : index
    %c0_0 = arith.constant 0 : index
    %0 = vector.load %arg1[%c0, %c0_0] : memref<8x16xf32, #tpu.memory_space<vmem>>, vector<8x16xf32>
    %c0_1 = arith.constant 0 : index
    %c0_2 = arith.constant 0 : index
    %1 = vector.load %arg5[%c0_1, %c0_2] : memref<8x128xf32, #tpu.memory_space<vmem>>, vector<1x128xf32>
    %c1 = arith.constant 1 : index
    %c0_3 = arith.constant 0 : index
    %2 = vector.load %arg5[%c1, %c0_3] : memref<8x128xf32, #tpu.memory_space<vmem>>, vector<1x128xf32>
    %c2 = arith.constant 2 : index
    %c0_4 = arith.constant 0 : index
    %3 = vector.load %arg5[%c2, %c0_4] : memref<8x128xf32, #tpu.memory_space<vmem>>, vector<1x128xf32>
    %4 = arith.truncf %0 : vector<8x16xf32> to vector<8x16xbf16>
    %c0_5 = arith.constant 0 : index
    %c0_6 = arith.constant 0 : index
    %5 = vector.load %arg2[%c0_5, %c0_6] : memref<16x128xbf16, #tpu.memory_space<vmem>>, vector<16x128xbf16>
    %cst = arith.constant dense<0.000000e+00> : vector<8x128xf32>
    %6 = tpu.matmul %4, %5, %cst {dimension_numbers = #tpu.dot_dimension_numbers<[1], [0], [0], [1], [0, 0, 1, 1], [], []>} : vector<8x16xbf16>, vector<16x128xbf16>, vector<8x128xf32> -> vector<8x128xf32>
    %7 = vector.broadcast %1 : vector<1x128xf32> to vector<8x128xf32>
    %8 = arith.addf %6, %7 : vector<8x128xf32>
    %cst_7 = arith.constant 0.000000e+00 : f32
    %9 = vector.broadcast %cst_7 : f32 to vector<8x128xf32>
    %10 = arith.maximumf %8, %9 : vector<8x128xf32>
    %11 = arith.truncf %10 : vector<8x128xf32> to vector<8x128xbf16>
    %c0_8 = arith.constant 0 : index
    %c0_9 = arith.constant 0 : index
    %12 = vector.load %arg3[%c0_8, %c0_9] : memref<128x128xbf16, #tpu.memory_space<vmem>>, vector<128x128xbf16>
    %cst_10 = arith.constant dense<0.000000e+00> : vector<8x128xf32>
    %13 = tpu.matmul %11, %12, %cst_10 {dimension_numbers = #tpu.dot_dimension_numbers<[1], [0], [0], [1], [0, 0, 1, 1], [], []>} : vector<8x128xbf16>, vector<128x128xbf16>, vector<8x128xf32> -> vector<8x128xf32>
    %14 = vector.broadcast %2 : vector<1x128xf32> to vector<8x128xf32>
    %15 = arith.addf %13, %14 : vector<8x128xf32>
    %cst_11 = arith.constant 0.000000e+00 : f32
    %16 = vector.broadcast %cst_11 : f32 to vector<8x128xf32>
    %17 = arith.maximumf %15, %16 : vector<8x128xf32>
    %18 = arith.truncf %17 : vector<8x128xf32> to vector<8x128xbf16>
    %c0_12 = arith.constant 0 : index
    %c0_13 = arith.constant 0 : index
    %19 = vector.load %arg4[%c0_12, %c0_13] : memref<128x128xbf16, #tpu.memory_space<vmem>>, vector<128x128xbf16>
    %cst_14 = arith.constant dense<0.000000e+00> : vector<8x128xf32>
    %20 = tpu.matmul %18, %19, %cst_14 {dimension_numbers = #tpu.dot_dimension_numbers<[1], [0], [0], [1], [0, 0, 1, 1], [], []>} : vector<8x128xbf16>, vector<128x128xbf16>, vector<8x128xf32> -> vector<8x128xf32>
    %21 = vector.broadcast %3 : vector<1x128xf32> to vector<8x128xf32>
    %22 = arith.addf %20, %21 : vector<8x128xf32>
    %cst_15 = arith.constant dense<0xFF800000> : vector<8xf32>
    %23 = vector.multi_reduction <maximumf>, %22, %cst_15 [1] : vector<8x128xf32> to vector<8xf32>
    %24 = vector.shape_cast %23 : vector<8xf32> to vector<8x1xf32>
    %25 = vector.broadcast %24 : vector<8x1xf32> to vector<8x128xf32>
    %26 = arith.subf %22, %25 : vector<8x128xf32>
    %27 = math.exp %26 : vector<8x128xf32>
    %cst_16 = arith.constant dense<0.000000e+00> : vector<8xf32>
    %28 = vector.multi_reduction <add>, %27, %cst_16 [1] : vector<8x128xf32> to vector<8xf32>
    %29 = vector.shape_cast %28 : vector<8xf32> to vector<8x1xf32>
    %30 = tpu.reciprocal %29 {approx = true} : vector<8x1xf32> -> vector<8x1xf32>
    %31 = vector.broadcast %30 : vector<8x1xf32> to vector<8x128xf32>
    %32 = arith.mulf %27, %31 : vector<8x128xf32>
    %33 = arith.truncf %32 : vector<8x128xf32> to vector<8x128xbf16>
    %c0_17 = arith.constant 0 : index
    %c0_18 = arith.constant 0 : index
    %34 = vector.load %arg6[%c0_17, %c0_18] : memref<8x128xbf16, #tpu.memory_space<vmem>>, vector<8x128xbf16>
    tpu.vector_store %arg6[%c0_17, %c0_18], %33 {strides = array<i32>} : memref<8x128xbf16, #tpu.memory_space<vmem>>, vector<8x128xbf16>,
    return
  }
  func.func @transform_0(%arg0: i32) -> (i32, i32) {
    %c0_i32 = arith.constant 0 : i32
    %c0_i32_0 = arith.constant 0 : i32
    return %arg0, %c0_i32 : i32, i32
  }
  func.func @transform_1(%arg0: i32) -> (i32, i32) {
    %c0_i32 = arith.constant 0 : i32
    %c0_i32_0 = arith.constant 0 : i32
    %c0_i32_1 = arith.constant 0 : i32
    return %c0_i32, %c0_i32_0 : i32, i32
  }
  func.func @transform_2(%arg0: i32) -> (i32, i32) {
    %c0_i32 = arith.constant 0 : i32
    %c0_i32_0 = arith.constant 0 : i32
    %c0_i32_1 = arith.constant 0 : i32
    return %c0_i32, %c0_i32_0 : i32, i32
  }
  func.func @transform_3(%arg0: i32) -> (i32, i32) {
    %c0_i32 = arith.constant 0 : i32
    %c0_i32_0 = arith.constant 0 : i32
    %c0_i32_1 = arith.constant 0 : i32
    return %c0_i32, %c0_i32_0 : i32, i32
  }
  func.func @transform_4(%arg0: i32) -> (i32, i32) {
    %c0_i32 = arith.constant 0 : i32
    %c0_i32_0 = arith.constant 0 : i32
    %c0_i32_1 = arith.constant 0 : i32
    return %c0_i32, %c0_i32_0 : i32, i32
  }
  func.func @transform_5(%arg0: i32) -> (i32, i32) {
    %c0_i32 = arith.constant 0 : i32
    %c0_i32_0 = arith.constant 0 : i32
    return %arg0, %c0_i32 : i32, i32
  }
}

</mosaic_0001>

<bundles_post_ra>
// kernel: tpu_custom_call.1
= control target key start
LH: loop header
LB: loop body
LE: loop exit
PB: predicated region body
PF: predicated region fallthrough
CT: control target
= control target key end

     0   :  { %10 = vsyncpa [#allocation3], 0  ;;  %s756_s0 = inlined_call_operand.hbm [shape: f32[8,16], index: 0, kind: input, shape index: {}]   ;;  %s757_s1 = inlined_call_operand.hbm [shape: bf16[16,128], index: 1, kind: input, shape index: {}]   ;;  %s758_s2 = inlined_call_operand.hbm [shape: bf16[128,128], index: 2, kind: input, shape index: {}]   ;;  %s759_s3 = inlined_call_operand.hbm [shape: bf16[128,128], index: 3, kind: input, shape index: {}]   ;;  %s760_s4 = inlined_call_operand.vmem [shape: f32[8,128], index: 4, kind: input, shape index: {}]   ;;  %s761_s5 = inlined_call_operand.hbm [shape: bf16[8,128], index: 5, kind: output, shape index: {}]  }
   0x1   :  { %11 = vsyncpa [#allocation6], 0 }
   0x2   :  { %12 = vsyncpa [#allocation9], 0 }
   0x3   :  { %13 = vsyncpa [#allocation4], 0  ;;  %s619_s18 = smov [#allocation5]   ;;  %s501_s22 = scalar_lea.hbm %s757_s1, 128 }
   0x4   :  { %s29_s19 = sshll.u32 %s619_s18, 4  ;;  %p502_p0 = scmp.ne.s32.totalorder %s757_s1, %s501_s22  ;;  %s30_s19 = int_to_ptr.vmem [resolvable:$true] %s29_s19 }
   0x5   :  { %p505_p1 = scmp.lt.u32.totalorder %s501_s22, %s757_s1 }
   0x7   :  { %p507_p2 = pnand %p505_p1, %p502_p0 }
   0x9   :  { %510 = shalt.err (!%p507_p2)
}
   0xa   :  { %s511_s27 = scalar_lea.vmem %s30_s19, 128  ;;  %p516_p4 = scmp.lt.s32.totalorder %s30_s19, %s30_s19 }
   0xb   :  { %p512_p3 = scmp.ne.s32.totalorder %s30_s19, %s511_s27  ;;  %p517_p5 = scmp.lt.s32.totalorder %s511_s27, %s511_s27 }
   0xd   :  { %p518_p6 = por %p517_p5, %p516_p4 }
   0xf   :  { %p519_p7 = pnand %p518_p6, %p512_p3 }
  0x11   :  { %522 = shalt.err (!%p519_p7)
}
  0x12   :  { %s620_s28 = smov 64   ;;  %s621_s29 = smov 4  }
  0x13   :  { %35 = dma.hbm_to_vmem [thread:$0]  %s757_s1, 128, %s30_s19, [#allocation6], %s620_s28, %s620_s28, %s621_s29  }
  0x14   :  { %s622_s7 = smov [#allocation2]   ;;  %s623_s9 = smov [#allocation7]  }
  0x15   :  { %s20_s8 = sshll.u32 %s622_s7, 4  ;;  %s41_s10 = sshll.u32 %s623_s9, 4  ;;  %s21_s8 = int_to_ptr.vmem [resolvable:$true] %s20_s8  ;;  %s42_s10 = int_to_ptr.vmem [resolvable:$true] %s41_s10 }
  0x16   :  { %s523_s13 = scalar_lea.hbm %s756_s0, 128 }
  0x17   :  { %p524_p8 = scmp.ne.s32.totalorder %s756_s0, %s523_s13  ;;  %p527_p9 = scmp.lt.u32.totalorder %s523_s13, %s756_s0 }
  0x19   :  { %p529_p10 = pnand %p527_p9, %p524_p8 }
  0x1b   :  { %532 = shalt.err (!%p529_p10)
}
  0x1c   :  { %s533_s1 = scalar_lea.vmem %s21_s8, 128  ;;  %p538_p12 = scmp.lt.s32.totalorder %s21_s8, %s21_s8 }
  0x1d   :  { %p534_p11 = scmp.ne.s32.totalorder %s21_s8, %s533_s1  ;;  %p539_p13 = scmp.lt.s32.totalorder %s533_s1, %s533_s1 }
  0x1f   :  { %p540_p0 = por %p539_p13, %p538_p12 }
  0x21   :  { %p541_p1 = pnand %p540_p0, %p534_p11 }
  0x23   :  { %544 = shalt.err (!%p541_p1)
}
  0x24   :  { %23 = dma.hbm_to_vmem [thread:$0]  %s756_s0, 128, %s21_s8, [#allocation3]  }
  0x25   :  { %s545_s22 = scalar_lea.hbm %s758_s2, 1024 }
  0x26   :  { %p546_p2 = scmp.ne.s32.totalorder %s758_s2, %s545_s22  ;;  %p549_p3 = scmp.lt.u32.totalorder %s545_s22, %s758_s2 }
  0x28   :  { %p551_p4 = pnand %p549_p3, %p546_p2 }
  0x2a   :  { %554 = shalt.err (!%p551_p4)
}
  0x2b   :  { %s555_s27 = scalar_lea.vmem %s42_s10, 1024  ;;  %p560_p6 = scmp.lt.s32.totalorder %s42_s10, %s42_s10 }
  0x2c   :  { %p556_p5 = scmp.ne.s32.totalorder %s42_s10, %s555_s27  ;;  %p561_p7 = scmp.lt.s32.totalorder %s555_s27, %s555_s27 }
  0x2e   :  { %p562_p8 = por %p561_p7, %p560_p6 }
  0x30   :  { %p563_p9 = pnand %p562_p8, %p556_p5 }
  0x32   :  { %566 = shalt.err (!%p563_p9)
}
  0x33   :  { %47 = dma.hbm_to_vmem [thread:$0]  %s758_s2, 1024, %s42_s10, [#allocation6], %s620_s28, %s620_s28, %s621_s29  }
  0x34   :  { %s624_s6 = smov [#allocation8]   ;;  %s567_s11 = scalar_lea.hbm %s759_s3, 1024 }
  0x35   :  { %s53_s7 = sshll.u32 %s624_s6, 4  ;;  %p568_p10 = scmp.ne.s32.totalorder %s759_s3, %s567_s11  ;;  %s54_s7 = int_to_ptr.vmem [resolvable:$true] %s53_s7 }
  0x36   :  { %p571_p11 = scmp.lt.u32.totalorder %s567_s11, %s759_s3 }
  0x38   :  { %p573_p12 = pnand %p571_p11, %p568_p10 }
  0x3a   :  { %576 = shalt.err (!%p573_p12)
}
  0x3b   :  { %s577_s16 = scalar_lea.vmem %s54_s7, 1024  ;;  %p582_p0 = scmp.lt.s32.totalorder %s54_s7, %s54_s7 }
  0x3c   :  { %p578_p13 = scmp.ne.s32.totalorder %s54_s7, %s577_s16  ;;  %p583_p1 = scmp.lt.s32.totalorder %s577_s16, %s577_s16 }
  0x3e   :  { %p584_p2 = por %p583_p1, %p582_p0 }
  0x40   :  { %p585_p3 = pnand %p584_p2, %p578_p13 }
  0x42   :  { %588 = shalt.err (!%p585_p3)
}
  0x43   :  { %59 = dma.hbm_to_vmem [thread:$0]  %s759_s3, 1024, %s54_s7, [#allocation9], %s620_s28, %s620_s28, %s621_s29  }
  0x44   :  { %611 = dma.done.wait [#allocation3], 128  }
  0x45   :  { %612 = vsyncadd [#allocation3], 4294967168 }
  0x46   :  { %613 = dma.done.wait [#allocation6], 1152  }
  0x47   :  { %614 = vsyncadd [#allocation6], 4294966144 }
  0x48   :  { %615 = dma.done.wait [#allocation9], 1024  }
  0x49   :  { %616 = vsyncadd [#allocation9], 4294966272  ;;  %v625_v0 = vmov 0.0   ;;  %vm626_vm0 = vmmov 0   ;;  %v480_v1 = vld [vmem:[#allocation5] sm:$0xff]   ;;  %v75_v2 = vld [vmem:[#allocation2] sm:$0xff] }
  0x4a   :  { %425 = vmatprep.subr.bf16.mxu0 %v625_v0  ;;  %427 = vmatprep.mubr.msk.bf16.mxu0 %vm626_vm0, %v625_v0  ;;  %v79_v3 = vpack.c.bf16 %v75_v2, %v75_v2  ;;  %vm92_vm1 = vcmask 130048   ;;  %v481_v4 = vld [vmem:[#allocation7] sm:$0xff]   ;;  %v482_v5 = vld [vmem:[#allocation7 + $0x8] sm:$0xff]   ;;  %v483_v6 = vld [vmem:[#allocation7 + $0x10] sm:$0xff]   ;;  %s627_s19 = smov [#allocation10]  }
  0x4b   :  { %431 = vmatprep.subr.bf16.mxu1 %v625_v0  ;;  %447 = vmatprep.mubr.msk.bf16.mxu1 %vm626_vm0, %v625_v0  ;;  %v484_v7 = vld [vmem:[#allocation7 + $0x18] sm:$0xff]   ;;  %v485_v8 = vld [vmem:[#allocation7 + $0x20] sm:$0xff]   ;;  %v486_v9 = vld [vmem:[#allocation7 + $0x28] sm:$0xff]   ;;  %s373_s20 = sshll.u32 %s627_s19, 4  ;;  %s374_s20 = int_to_ptr.vmem [resolvable:$true] %s373_s20 }
  0x4c   :  { %426 = vmatpush3.bf16.msra.mxu0 %v480_v1  ;;  %432 = vmatpush3.bf16.msra.mxu1 %v481_v4  ;;  %v487_v10 = vld [vmem:[#allocation7 + $0x30] sm:$0xff]   ;;  %v488_v11 = vld [vmem:[#allocation7 + $0x38] sm:$0xff]   ;;  %v489_v12 = vld [vmem:[#allocation8] sm:$0xff]   ;;  %p594_p5 = scmp.lt.s32.totalorder %s374_s20, %s374_s20 }
  0x4d   :  { %451 = vmatprep.subr.bf16.mxu0 %v625_v0  ;;  %433 = vmatprep.subr.bf16.mxu1 %v625_v0  ;;  %v490_v13 = vld [vmem:[#allocation8 + $0x8] sm:$0xff]   ;;  %v491_v14 = vld [vmem:[#allocation8 + $0x10] sm:$0xff]   ;;  %v492_v15 = vld [vmem:[#allocation8 + $0x18] sm:$0xff]  }
  0x4e   :  { %v493_v16 = vld [vmem:[#allocation8 + $0x20] sm:$0xff]   ;;  %v494_v17 = vld [vmem:[#allocation8 + $0x28] sm:$0xff]   ;;  %v384_v18 = vld [vmem:[%s760_s4] ss:$0 sm:$0xff] }
  0x4f   :  { %428 = vmatmul.mubr.msk.bf16.vlgmr.msra.gmra.mrb[0].mxu0 %vm92_vm1, %v79_v3  ;;  %v495_v26 = vld [vmem:[#allocation8 + $0x30] sm:$0xff]   ;;  %v496_v27 = vld [vmem:[#allocation8 + $0x38] sm:$0xff]  }
  0x50   :  { %467 = vmatprep.mubr.msk.bf16.mxu0 %vm626_vm0, %v625_v0  ;;  %434 = vmatpush3.bf16.msra.mxu1 %v482_v5  ;;  %v387_v28 = vld [vmem:[%s760_s4 + $0x1] ss:$0 sm:$0xff]  ;;  %v396_v36 = vld [vmem:[%s760_s4 + $0x2] ss:$0 sm:$0xff]  ;;  %s589_s4 = scalar_lea.vmem %s374_s20, 64 }
  0x51   :  { %435 = vmatprep.subr.bf16.mxu1 %v625_v0  ;;  %452 = vmatpush3.bf16.msra.mxu0 %v489_v12  ;;  %p590_p4 = scmp.ne.s32.totalorder %s374_s20, %s589_s4  ;;  %p595_p6 = scmp.lt.s32.totalorder %s589_s4, %s589_s4 }
  0x52   :  { %453 = vmatprep.subr.bf16.mxu0 %v625_v0 }
  0x53   :  { %p596_p7 = por %p595_p6, %p594_p5 }
  0x54   :  { %436 = vmatpush3.bf16.msra.mxu1 %v483_v6 }
  0x55   :  { %437 = vmatprep.subr.bf16.mxu1 %v625_v0  ;;  %454 = vmatpush3.bf16.msra.mxu0 %v490_v13  ;;  %p597_p8 = pnand %p596_p7, %p590_p4 }
  0x56   :  { %455 = vmatprep.subr.bf16.mxu0 %v625_v0 }
  0x58   :  { %438 = vmatpush3.bf16.msra.mxu1 %v484_v7 }
  0x59   :  { %439 = vmatprep.subr.bf16.mxu1 %v625_v0  ;;  %456 = vmatpush3.bf16.msra.mxu0 %v491_v14 }
  0x5a   :  { %457 = vmatprep.subr.bf16.mxu0 %v625_v0 }
  0x5c   :  { %440 = vmatpush3.bf16.msra.mxu1 %v485_v8 }
  0x5d   :  { %441 = vmatprep.subr.bf16.mxu1 %v625_v0  ;;  %458 = vmatpush3.bf16.msra.mxu0 %v492_v15 }
  0x5e   :  { %459 = vmatprep.subr.bf16.mxu0 %v625_v0 }
  0x60   :  { %442 = vmatpush3.bf16.msra.mxu1 %v486_v9 }
  0x61   :  { %443 = vmatprep.subr.bf16.mxu1 %v625_v0  ;;  %460 = vmatpush3.bf16.msra.mxu0 %v493_v16 }
  0x62   :  { %461 = vmatprep.subr.bf16.mxu0 %v625_v0 }
  0x64   :  { %444 = vmatpush3.bf16.msra.mxu1 %v487_v10 }
  0x65   :  { %445 = vmatprep.subr.bf16.mxu1 %v625_v0  ;;  %462 = vmatpush3.bf16.msra.mxu0 %v494_v17 }
  0x66   :  { %463 = vmatprep.subr.bf16.mxu0 %v625_v0 }
  0x68   :  { %446 = vmatpush3.bf16.msra.mxu1 %v488_v11 }
  0x69   :  { %464 = vmatpush3.bf16.msra.mxu0 %v495_v26 }
  0x6a   :  { %465 = vmatprep.subr.bf16.mxu0 %v625_v0 }
  0x6d   :  { %466 = vmatpush3.bf16.msra.mxu0 %v496_v27 }
 0x122   :  { %v130_v19 = vpop.f32.mrb[0].mxu0 }
 0x123   :  { %v131_v20 = vadd.f32 %v384_v18, %v130_v19  ;;  %v429_v21 = vpop.f32.mrb[1].mxu0 }
 0x124   :  { %v133_v22 = vpop.f32.mrb[2].mxu0 }
 0x125   :  { %v136_v23 = vmax.f32 %v131_v20, 0.0  ;;  %v430_v24 = vpop.f32.mrb[3].mxu0 }
 0x127   :  { %v137_v25 = vpack.c.bf16 %v136_v23, %v136_v23 }
 0x129   :  { %448 = vmatmul.mubr.bf16.vlgmr.msra.gmra.mrb[0].mxu1 %v137_v25 }
 0x1fc   :  { %v240_v29 = vpop.f32.mrb[0].mxu1 }
 0x1fd   :  { %v241_v30 = vadd.f32 %v387_v28, %v240_v29  ;;  %v449_v31 = vpop.f32.mrb[1].mxu1 }
 0x1fe   :  { %v243_v32 = vpop.f32.mrb[2].mxu1 }
 0x1ff   :  { %v246_v33 = vmax.f32 %v241_v30, 0.0  ;;  %v450_v34 = vpop.f32.mrb[3].mxu1 }
 0x201   :  { %v247_v35 = vpack.c.bf16 %v246_v33, %v246_v33 }
 0x203   :  { %468 = vmatmul.mubr.bf16.vlgmr.msra.gmra.mrb[4].mxu0 %v247_v35 }
 0x2d6   :  { %v350_v37 = vpop.f32.mrb[4].mxu0 }
 0x2d7   :  { %v351_v38 = vadd.f32 %v396_v36, %v350_v37  ;;  %v469_v39 = vpop.f32.mrb[5].mxu0 }
 0x2d8   :  { %v353_v40 = vpop.f32.mrb[6].mxu0 }
 0x2d9   :  { %356 = vmax.xlane.f32.xlu0 %v351_v38  ;;  %v470_v41 = vpop.f32.mrb[7].mxu0 }
 0x366   :  { %v357_v42 = vpop.xlane.xlu0 %356 }
 0x367   :  { %v358_v43 = vsub.f32 %v351_v38, %v357_v42 }
 0x369   :  { %v359_v44 = vmul.f32 1.442695, %v358_v43 }
 0x36b   :  { %497 = vpow2.f32 %v359_v44 }
 0x375   :  { %v498_v45 = vpop.eup %497 }
 0x376   :  { %361 = vadd.xlane.f32.xlu0 %v498_v45 }
 0x403   :  { %v362_v46 = vpop.xlane.xlu0 %361 }
 0x404   :  { %499 = vrcp.f32 %v362_v46 }
 0x40e   :  { %v500_v47 = vpop.eup %499 }
 0x40f   :  { %v364_v48 = vmul.f32 %v500_v47, %v498_v45 }
 0x411   :  { %v365_v49 = vpack.c.bf16 %v364_v48, %v364_v48 }
 0x413   :  { %366 = vst [vmem:[#allocation10] sm:$0xf] %v365_v49 }
 0x414   :  { %600 = shalt.err (!%p597_p8)
}
 0x415   :  { %s601_s23 = scalar_lea.hbm %s761_s5, 64 }
 0x416   :  { %p602_p9 = scmp.ne.s32.totalorder %s761_s5, %s601_s23  ;;  %p605_p10 = scmp.lt.u32.totalorder %s601_s23, %s761_s5 }
 0x418   :  { %p607_p11 = pnand %p605_p10, %p602_p9 }
 0x41a   :  { %610 = shalt.err (!%p607_p11)
}
 0x41b   :  { %376 = dma.vmem_to_hbm [thread:$0]  %s374_s20, 64, %s761_s5, [#allocation4]  }
 0x41c   :  { %617 = dma.done.wait [#allocation4], 64  }
 0x41d   :  { %618 = vsyncadd [#allocation4], 4294967232 }
 0x41e   :  { %380 = vsyncpa [#allocation3], 1 }
 0x41f   :  { %381 = vsyncpa [#allocation6], 1 }
 0x420   :  { %382 = vsyncpa [#allocation9], 1 }
 0x421   :  { %383 = vsyncpa [#allocation4], 1 }

// kernel: tpu_custom_call.1
= control target key start
LH: loop header
LB: loop body
LE: loop exit
PB: predicated region body
PF: predicated region fallthrough
CT: control target
= control target key end

     0   :  { %10 = vsyncpa [#allocation3], 0  ;;  %s756_s0 = inlined_call_operand.hbm [shape: f32[8,16], index: 0, kind: input, shape index: {}]   ;;  %s757_s1 = inlined_call_operand.hbm [shape: bf16[16,128], index: 1, kind: input, shape index: {}]   ;;  %s758_s2 = inlined_call_operand.hbm [shape: bf16[128,128], index: 2, kind: input, shape index: {}]   ;;  %s759_s3 = inlined_call_operand.hbm [shape: bf16[128,128], index: 3, kind: input, shape index: {}]   ;;  %s760_s4 = inlined_call_operand.vmem [shape: f32[8,128], index: 4, kind: input, shape index: {}]   ;;  %s761_s5 = inlined_call_operand.hbm [shape: bf16[8,128], index: 5, kind: output, shape index: {}]  }
   0x1   :  { %11 = vsyncpa [#allocation6], 0 }
   0x2   :  { %12 = vsyncpa [#allocation9], 0 }
   0x3   :  { %13 = vsyncpa [#allocation4], 0  ;;  %s619_s18 = smov [#allocation5]   ;;  %s501_s22 = scalar_lea.hbm %s757_s1, 128 }
   0x4   :  { %s29_s19 = sshll.u32 %s619_s18, 4  ;;  %p502_p0 = scmp.ne.s32.totalorder %s757_s1, %s501_s22  ;;  %s30_s19 = int_to_ptr.vmem [resolvable:$true] %s29_s19 }
   0x5   :  { %p505_p1 = scmp.lt.u32.totalorder %s501_s22, %s757_s1 }
   0x7   :  { %p507_p2 = pnand %p505_p1, %p502_p0 }
   0x9   :  { %510 = shalt.err (!%p507_p2)
}
   0xa   :  { %s511_s27 = scalar_lea.vmem %s30_s19, 128  ;;  %p516_p4 = scmp.lt.s32.totalorder %s30_s19, %s30_s19 }
   0xb   :  { %p512_p3 = scmp.ne.s32.totalorder %s30_s19, %s511_s27  ;;  %p517_p5 = scmp.lt.s32.totalorder %s511_s27, %s511_s27 }
   0xd   :  { %p518_p6 = por %p517_p5, %p516_p4 }
   0xf   :  { %p519_p7 = pnand %p518_p6, %p512_p3 }
  0x11   :  { %522 = shalt.err (!%p519_p7)
}
  0x12   :  { %s620_s28 = smov 64   ;;  %s621_s29 = smov 4  }
  0x13   :  { %35 = dma.hbm_to_vmem [thread:$0]  %s757_s1, 128, %s30_s19, [#allocation6], %s620_s28, %s620_s28, %s621_s29  }
  0x14   :  { %s622_s7 = smov [#allocation2]   ;;  %s623_s9 = smov [#allocation7]  }
  0x15   :  { %s20_s8 = sshll.u32 %s622_s7, 4  ;;  %s41_s10 = sshll.u32 %s623_s9, 4  ;;  %s21_s8 = int_to_ptr.vmem [resolvable:$true] %s20_s8  ;;  %s42_s10 = int_to_ptr.vmem [resolvable:$true] %s41_s10 }
  0x16   :  { %s523_s13 = scalar_lea.hbm %s756_s0, 128 }
  0x17   :  { %p524_p8 = scmp.ne.s32.totalorder %s756_s0, %s523_s13  ;;  %p527_p9 = scmp.lt.u32.totalorder %s523_s13, %s756_s0 }
  0x19   :  { %p529_p10 = pnand %p527_p9, %p524_p8 }
  0x1b   :  { %532 = shalt.err (!%p529_p10)
}
  0x1c   :  { %s533_s1 = scalar_lea.vmem %s21_s8, 128  ;;  %p538_p12 = scmp.lt.s32.totalorder %s21_s8, %s21_s8 }
  0x1d   :  { %p534_p11 = scmp.ne.s32.totalorder %s21_s8, %s533_s1  ;;  %p539_p13 = scmp.lt.s32.totalorder %s533_s1, %s533_s1 }
  0x1f   :  { %p540_p0 = por %p539_p13, %p538_p12 }
  0x21   :  { %p541_p1 = pnand %p540_p0, %p534_p11 }
  0x23   :  { %544 = shalt.err (!%p541_p1)
}
  0x24   :  { %23 = dma.hbm_to_vmem [thread:$0]  %s756_s0, 128, %s21_s8, [#allocation3]  }
  0x25   :  { %s545_s22 = scalar_lea.hbm %s758_s2, 1024 }
  0x26   :  { %p546_p2 = scmp.ne.s32.totalorder %s758_s2, %s545_s22  ;;  %p549_p3 = scmp.lt.u32.totalorder %s545_s22, %s758_s2 }
  0x28   :  { %p551_p4 = pnand %p549_p3, %p546_p2 }
  0x2a   :  { %554 = shalt.err (!%p551_p4)
}
  0x2b   :  { %s555_s27 = scalar_lea.vmem %s42_s10, 1024  ;;  %p560_p6 = scmp.lt.s32.totalorder %s42_s10, %s42_s10 }
  0x2c   :  { %p556_p5 = scmp.ne.s32.totalorder %s42_s10, %s555_s27  ;;  %p561_p7 = scmp.lt.s32.totalorder %s555_s27, %s555_s27 }
  0x2e   :  { %p562_p8 = por %p561_p7, %p560_p6 }
  0x30   :  { %p563_p9 = pnand %p562_p8, %p556_p5 }
  0x32   :  { %566 = shalt.err (!%p563_p9)
}
  0x33   :  { %47 = dma.hbm_to_vmem [thread:$0]  %s758_s2, 1024, %s42_s10, [#allocation6], %s620_s28, %s620_s28, %s621_s29  }
  0x34   :  { %s624_s6 = smov [#allocation8]   ;;  %s567_s11 = scalar_lea.hbm %s759_s3, 1024 }
  0x35   :  { %s53_s7 = sshll.u32 %s624_s6, 4  ;;  %p568_p10 = scmp.ne.s32.totalorder %s759_s3, %s567_s11  ;;  %s54_s7 = int_to_ptr.vmem [resolvable:$true] %s53_s7 }
  0x36   :  { %p571_p11 = scmp.lt.u32.totalorder %s567_s11, %s759_s3 }
  0x38   :  { %p573_p12 = pnand %p571_p11, %p568_p10 }
  0x3a   :  { %576 = shalt.err (!%p573_p12)
}
  0x3b   :  { %s577_s16 = scalar_lea.vmem %s54_s7, 1024  ;;  %p582_p0 = scmp.lt.s32.totalorder %s54_s7, %s54_s7 }
  0x3c   :  { %p578_p13 = scmp.ne.s32.totalorder %s54_s7, %s577_s16  ;;  %p583_p1 = scmp.lt.s32.totalorder %s577_s16, %s577_s16 }
  0x3e   :  { %p584_p2 = por %p583_p1, %p582_p0 }
  0x40   :  { %p585_p3 = pnand %p584_p2, %p578_p13 }
  0x42   :  { %588 = shalt.err (!%p585_p3)
}
  0x43   :  { %59 = dma.hbm_to_vmem [thread:$0]  %s759_s3, 1024, %s54_s7, [#allocation9], %s620_s28, %s620_s28, %s621_s29  }
  0x44   :  { %611 = dma.done.wait [#allocation3], 128  }
  0x45   :  { %612 = vsyncadd [#allocation3], 4294967168 }
  0x46   :  { %613 = dma.done.wait [#allocation6], 1152  }
  0x47   :  { %614 = vsyncadd [#allocation6], 4294966144 }
  0x48   :  { %615 = dma.done.wait [#allocation9], 1024  }
  0x49   :  { %616 = vsyncadd [#allocation9], 4294966272  ;;  %v625_v0 = vmov 0.0   ;;  %vm626_vm0 = vmmov 0   ;;  %v480_v1 = vld [vmem:[#allocation5] sm:$0xff]   ;;  %v75_v2 = vld [vmem:[#allocation2] sm:$0xff] }
  0x4a   :  { %425 = vmatprep.subr.bf16.mxu0 %v625_v0  ;;  %427 = vmatprep.mubr.msk.bf16.mxu0 %vm626_vm0, %v625_v0  ;;  %v79_v3 = vpack.c.bf16 %v75_v2, %v75_v2  ;;  %vm92_vm1 = vcmask 130048   ;;  %v481_v4 = vld [vmem:[#allocation7] sm:$0xff]   ;;  %v482_v5 = vld [vmem:[#allocation7 + $0x8] sm:$0xff]   ;;  %v483_v6 = vld [vmem:[#allocation7 + $0x10] sm:$0xff]   ;;  %s627_s19 = smov [#allocation10]  }
  0x4b   :  { %431 = vmatprep.subr.bf16.mxu1 %v625_v0  ;;  %447 = vmatprep.mubr.msk.bf16.mxu1 %vm626_vm0, %v625_v0  ;;  %v484_v7 = vld [vmem:[#allocation7 + $0x18] sm:$0xff]   ;;  %v485_v8 = vld [vmem:[#allocation7 + $0x20] sm:$0xff]   ;;  %v486_v9 = vld [vmem:[#allocation7 + $0x28] sm:$0xff]   ;;  %s373_s20 = sshll.u32 %s627_s19, 4  ;;  %s374_s20 = int_to_ptr.vmem [resolvable:$true] %s373_s20 }
  0x4c   :  { %426 = vmatpush3.bf16.msra.mxu0 %v480_v1  ;;  %432 = vmatpush3.bf16.msra.mxu1 %v481_v4  ;;  %v487_v10 = vld [vmem:[#allocation7 + $0x30] sm:$0xff]   ;;  %v488_v11 = vld [vmem:[#allocation7 + $0x38] sm:$0xff]   ;;  %v489_v12 = vld [vmem:[#allocation8] sm:$0xff]   ;;  %p594_p5 = scmp.lt.s32.totalorder %s374_s20, %s374_s20 }
  0x4d   :  { %451 = vmatprep.subr.bf16.mxu0 %v625_v0  ;;  %433 = vmatprep.subr.bf16.mxu1 %v625_v0  ;;  %v490_v13 = vld [vmem:[#allocation8 + $0x8] sm:$0xff]   ;;  %v491_v14 = vld [vmem:[#allocation8 + $0x10] sm:$0xff]   ;;  %v492_v15 = vld [vmem:[#allocation8 + $0x18] sm:$0xff]  }
  0x4e   :  { %v493_v16 = vld [vmem:[#allocation8 + $0x20] sm:$0xff]   ;;  %v494_v17 = vld [vmem:[#allocation8 + $0x28] sm:$0xff]   ;;  %v384_v18 = vld [vmem:[%s760_s4] ss:$0 sm:$0xff] }
  0x4f   :  { %428 = vmatmul.mubr.msk.bf16.vlgmr.msra.gmra.mrb[0].mxu0 %vm92_vm1, %v79_v3  ;;  %v495_v26 = vld [vmem:[#allocation8 + $0x30] sm:$0xff]   ;;  %v496_v27 = vld [vmem:[#allocation8 + $0x38] sm:$0xff]  }
  0x50   :  { %467 = vmatprep.mubr.msk.bf16.mxu0 %vm626_vm0, %v625_v0  ;;  %434 = vmatpush3.bf16.msra.mxu1 %v482_v5  ;;  %v387_v28 = vld [vmem:[%s760_s4 + $0x1] ss:$0 sm:$0xff]  ;;  %v396_v36 = vld [vmem:[%s760_s4 + $0x2] ss:$0 sm:$0xff]  ;;  %s589_s4 = scalar_lea.vmem %s374_s20, 64 }
  0x51   :  { %435 = vmatprep.subr.bf16.mxu1 %v625_v0  ;;  %452 = vmatpush3.bf16.msra.mxu0 %v489_v12  ;;  %p590_p4 = scmp.ne.s32.totalorder %s374_s20, %s589_s4  ;;  %p595_p6 = scmp.lt.s32.totalorder %s589_s4, %s589_s4 }
  0x52   :  { %453 = vmatprep.subr.bf16.mxu0 %v625_v0 }
  0x53   :  { %p596_p7 = por %p595_p6, %p594_p5 }
  0x54   :  { %436 = vmatpush3.bf16.msra.mxu1 %v483_v6 }
  0x55   :  { %437 = vmatprep.subr.bf16.mxu1 %v625_v0  ;;  %454 = vmatpush3.bf16.msra.mxu0 %v490_v13  ;;  %p597_p8 = pnand %p596_p7, %p590_p4 }
  0x56   :  { %455 = vmatprep.subr.bf16.mxu0 %v625_v0 }
  0x58   :  { %438 = vmatpush3.bf16.msra.mxu1 %v484_v7 }
  0x59   :  { %439 = vmatprep.subr.bf16.mxu1 %v625_v0  ;;  %456 = vmatpush3.bf16.msra.mxu0 %v491_v14 }
  0x5a   :  { %457 = vmatprep.subr.bf16.mxu0 %v625_v0 }
  0x5c   :  { %440 = vmatpush3.bf16.msra.mxu1 %v485_v8 }
  0x5d   :  { %441 = vmatprep.subr.bf16.mxu1 %v625_v0  ;;  %458 = vmatpush3.bf16.msra.mxu0 %v492_v15 }
  0x5e   :  { %459 = vmatprep.subr.bf16.mxu0 %v625_v0 }
  0x60   :  { %442 = vmatpush3.bf16.msra.mxu1 %v486_v9 }
  0x61   :  { %443 = vmatprep.subr.bf16.mxu1 %v625_v0  ;;  %460 = vmatpush3.bf16.msra.mxu0 %v493_v16 }
  0x62   :  { %461 = vmatprep.subr.bf16.mxu0 %v625_v0 }
  0x64   :  { %444 = vmatpush3.bf16.msra.mxu1 %v487_v10 }
  0x65   :  { %445 = vmatprep.subr.bf16.mxu1 %v625_v0  ;;  %462 = vmatpush3.bf16.msra.mxu0 %v494_v17 }
  0x66   :  { %463 = vmatprep.subr.bf16.mxu0 %v625_v0 }
  0x68   :  { %446 = vmatpush3.bf16.msra.mxu1 %v488_v11 }
  0x69   :  { %464 = vmatpush3.bf16.msra.mxu0 %v495_v26 }
  0x6a   :  { %465 = vmatprep.subr.bf16.mxu0 %v625_v0 }
  0x6d   :  { %466 = vmatpush3.bf16.msra.mxu0 %v496_v27 }
 0x122   :  { %v130_v19 = vpop.f32.mrb[0].mxu0 }
 0x123   :  { %v131_v20 = vadd.f32 %v384_v18, %v130_v19  ;;  %v429_v21 = vpop.f32.mrb[1].mxu0 }
 0x124   :  { %v133_v22 = vpop.f32.mrb[2].mxu0 }
 0x125   :  { %v136_v23 = vmax.f32 %v131_v20, 0.0  ;;  %v430_v24 = vpop.f32.mrb[3].mxu0 }
 0x127   :  { %v137_v25 = vpack.c.bf16 %v136_v23, %v136_v23 }
 0x129   :  { %448 = vmatmul.mubr.bf16.vlgmr.msra.gmra.mrb[0].mxu1 %v137_v25 }
 0x1fc   :  { %v240_v29 = vpop.f32.mrb[0].mxu1 }
 0x1fd   :  { %v241_v30 = vadd.f32 %v387_v28, %v240_v29  ;;  %v449_v31 = vpop.f32.mrb[1].mxu1 }
 0x1fe   :  { %v243_v32 = vpop.f32.mrb[2].mxu1 }
 0x1ff   :  { %v246_v33 = vmax.f32 %v241_v30, 0.0  ;;  %v450_v34 = vpop.f32.mrb[3].mxu1 }
 0x201   :  { %v247_v35 = vpack.c.bf16 %v246_v33, %v246_v33 }
 0x203   :  { %468 = vmatmul.mubr.bf16.vlgmr.msra.gmra.mrb[4].mxu0 %v247_v35 }
 0x2d6   :  { %v350_v37 = vpop.f32.mrb[4].mxu0 }
 0x2d7   :  { %v351_v38 = vadd.f32 %v396_v36, %v350_v37  ;;  %v469_v39 = vpop.f32.mrb[5].mxu0 }
 0x2d8   :  { %v353_v40 = vpop.f32.mrb[6].mxu0 }
 0x2d9   :  { %356 = vmax.xlane.f32.xlu0 %v351_v38  ;;  %v470_v41 = vpop.f32.mrb[7].mxu0 }
 0x366   :  { %v357_v42 = vpop.xlane.xlu0 %356 }
 0x367   :  { %v358_v43 = vsub.f32 %v351_v38, %v357_v42 }
 0x369   :  { %v359_v44 = vmul.f32 1.442695, %v358_v43 }
 0x36b   :  { %497 = vpow2.f32 %v359_v44 }
 0x375   :  { %v498_v45 = vpop.eup %497 }
 0x376   :  { %361 = vadd.xlane.f32.xlu0 %v498_v45 }
 0x403   :  { %v362_v46 = vpop.xlane.xlu0 %361 }
 0x404   :  { %499 = vrcp.f32 %v362_v46 }
 0x40e   :  { %v500_v47 = vpop.eup %499 }
 0x40f   :  { %v364_v48 = vmul.f32 %v500_v47, %v498_v45 }
 0x411   :  { %v365_v49 = vpack.c.bf16 %v364_v48, %v364_v48 }
 0x413   :  { %366 = vst [vmem:[#allocation10] sm:$0xf] %v365_v49 }
 0x414   :  { %600 = shalt.err (!%p597_p8)
}
 0x415   :  { %s601_s23 = scalar_lea.hbm %s761_s5, 64 }
 0x416   :  { %p602_p9 = scmp.ne.s32.totalorder %s761_s5, %s601_s23  ;;  %p605_p10 = scmp.lt.u32.totalorder %s601_s23, %s761_s5 }
 0x418   :  { %p607_p11 = pnand %p605_p10, %p602_p9 }
 0x41a   :  { %610 = shalt.err (!%p607_p11)
}
 0x41b   :  { %376 = dma.vmem_to_hbm [thread:$0]  %s374_s20, 64, %s761_s5, [#allocation4]  }
 0x41c   :  { %617 = dma.done.wait [#allocation4], 64  }
 0x41d   :  { %618 = vsyncadd [#allocation4], 4294967232 }
 0x41e   :  { %380 = vsyncpa [#allocation3], 1 }
 0x41f   :  { %381 = vsyncpa [#allocation6], 1 }
 0x420   :  { %382 = vsyncpa [#allocation9], 1 }
 0x421   :  { %383 = vsyncpa [#allocation4], 1 }

</bundles_post_ra>
